<compile_context>
chip_gen: v5e
topology: v5e:2x2
jax: 0.10.0
libtpu: 0.0.40
codegen_flags: <defaults>
</compile_context>

<pallas_src>
import functools
import math

import numpy as np
import jax
import jax.numpy as jnp
from jax import lax
from jax.experimental import pallas as pl
from jax.experimental.pallas import tpu as pltpu


LANES = 128           # TPU lane width
DEFAULT_CHUNK = 128   # time steps per grid iteration
DEFAULT_UNROLL = 8    # statically unrolled steps per fori_loop iteration


def _round_up(v, m):
    return (v + m - 1) // m * m


def snn_chunk_kernel(x_ref,                                    # (CHUNK, 1)  f32 VMEM
                     f_ref, bcomb_ref, d_ref,                  # (1, Np)     f32 VMEM
                     memout_ref, spk_hist_ref, mem1_hist_ref,  # (CHUNK,1), (CHUNK,Np), (CHUNK,Np)
                     mem1_s, q_s,                              # carried state (VMEM scratch)
                     *, beta_v, beta_x, chunk, unroll):
    """Processes `chunk` time steps of the spiking recurrence per grid step.

    Semantics (snntorch, init_hidden=True, threshold=1.0):
      y      = F * x_t + b_in
      rec    = W @ spk_prev + b_rec,   W = -(F @ D)  ==  -(D.spk_prev)*F + b_rec
      reset  = H(mem1_prev - 1)  ==  spk_prev
      mem1   = (beta_v*mem1_prev + y + rec) * (1 - reset)     (reset='zero')
      spk1   = H(mem1 - 1)
      mem2   = beta_x*mem2_prev + spk1                        (Leaky, reset='none')
      out    = D @ mem2 + b_out  ==  q_t + b_out,  q_t = beta_x*q_{t-1} + D.spk1
    (b_out is added in the wrapper.)
    """
    c = pl.program_id(0)

    @pl.when(c == 0)
    def _():
        mem1_s[...] = jnp.zeros_like(mem1_s)
        q_s[...] = jnp.zeros_like(q_s)

    f = f_ref[...]          # (1, Np) input weight column as a lane row
    bcomb = bcomb_ref[...]  # (1, Np) b_in + b_rec, pre-combined
    d = d_ref[...]          # (1, Np) readout weight row

    # Rebuild derived carried state from mem (spk == H(mem-1), s == D.spk), so
    # only mem1 and q live in scratch across chunks.
    mem0 = mem1_s[...]                                     # (1, Np)
    spk0 = (mem0 > 1.0).astype(jnp.float32)                # previous spike
    s0 = jnp.sum(d * spk0, axis=-1, keepdims=True)         # (1, 1) D.spk_prev
    q0 = q_s[...]                                          # (1, 1) D.mem2_prev

    def sub_block(blk, carry):
        mem, spk, s, q = carry
        base_t = pl.multiple_of(blk * unroll, unroll)
        for k in range(unroll):            # static unroll: LLO overlaps across steps
            t = base_t + k
            xt = x_ref[pl.ds(t, 1), :]                       # (1, 1)
            drive = xt * f + bcomb                           # s-independent (off chain)
            base = beta_v * mem + drive - s * f              # rank-1 recurrent drive
            mem = base * (1.0 - spk)                         # zero-reset w/ prev spike
            spk = (mem > 1.0).astype(jnp.float32)            # fire
            s = jnp.sum(d * spk, axis=-1, keepdims=True)     # D.spk (XLU lane reduce)
            q = beta_x * q + s                               # scalar Leaky readout
            spk_hist_ref[pl.ds(t, 1), :] = spk
            mem1_hist_ref[pl.ds(t, 1), :] = mem
            memout_ref[pl.ds(t, 1), :] = q                   # b_out added in wrapper
        return (mem, spk, s, q)

    mem_f, _, _, q_f = lax.fori_loop(0, chunk // unroll, sub_block,
                                     (mem0, spk0, s0, q0))

    mem1_s[...] = mem_f
    q_s[...] = q_f


def run_snn(x, F, b_in, b_rec, D, b_out, beta_v, beta_x,
            chunk=DEFAULT_CHUNK, unroll=DEFAULT_UNROLL):
    """x: (T, 1). Returns (mem_output (T,1), spk_lc1 (T,N), mem_lc1 (T,N)).

    Exploits W = -(F @ D) from the module's __init__, so W is never materialized.
    """
    T = int(x.shape[0])
    N = int(F.shape[0])
    unroll = min(unroll, chunk)
    assert chunk % unroll == 0, "chunk must be a multiple of unroll"

    N_pad = _round_up(N, LANES)
    T_pad = _round_up(max(T, 1), chunk)
    n_chunks = T_pad // chunk

    x_col = jnp.zeros((T_pad, 1), jnp.float32).at[:T, 0].set(
        jnp.asarray(x, jnp.float32).reshape(T))

    def pad_row(v):
        row = jnp.zeros((1, N_pad), jnp.float32)
        return row.at[0, :N].set(jnp.asarray(v, jnp.float32).reshape(N))

    f_row = pad_row(F)                                              # input_layer.weight (N,1)
    bcomb_row = pad_row(jnp.asarray(b_in, jnp.float32)
                        + jnp.asarray(b_rec, jnp.float32))          # b_in + b_rec
    d_row = pad_row(D)                                              # output_layer.weight (1,N)

    kernel = functools.partial(snn_chunk_kernel, beta_v=float(beta_v),
                               beta_x=float(beta_x), chunk=chunk, unroll=unroll)

    grid_spec = pltpu.PrefetchScalarGridSpec(
        num_scalar_prefetch=0,
        grid=(n_chunks,),
        in_specs=[
            pl.BlockSpec((chunk, 1), lambda i: (i, 0)),       # x chunk
            pl.BlockSpec((1, N_pad), lambda i: (0, 0)),       # F row
            pl.BlockSpec((1, N_pad), lambda i: (0, 0)),       # b_in + b_rec
            pl.BlockSpec((1, N_pad), lambda i: (0, 0)),       # D row
        ],
        out_specs=[
            pl.BlockSpec((chunk, 1), lambda i: (i, 0)),       # q -> mem_output
            pl.BlockSpec((chunk, N_pad), lambda i: (i, 0)),   # spk_lc1
            pl.BlockSpec((chunk, N_pad), lambda i: (i, 0)),   # mem_lc1
        ],
        scratch_shapes=[
            pltpu.VMEM((1, N_pad), jnp.float32),   # mem1 state, carried across chunks
            pltpu.VMEM((1, 1), jnp.float32),       # q = D . mem2, carried across chunks
        ],
    )

    memout, spk_hist, mem1_hist = pl.pallas_call(
        kernel,
        out_shape=(
            jax.ShapeDtypeStruct((T_pad, 1), jnp.float32),
            jax.ShapeDtypeStruct((T_pad, N_pad), jnp.float32),
            jax.ShapeDtypeStruct((T_pad, N_pad), jnp.float32),
        ),
        grid_spec=grid_spec,
        compiler_params=pltpu.CompilerParams(
            dimension_semantics=("arbitrary",)),   # time recurrence is serial
    )(x_col, f_row, bcomb_row, d_row)

    b_out_f = jnp.asarray(b_out, jnp.float32).reshape(1, 1)
    return memout[:T] + b_out_f, spk_hist[:T, :N], mem1_hist[:T, :N]


def ref_snn(x, F, b_in, W, b_rec, D, b_out, beta_v, beta_x):
    """Pure-numpy float32 reference mirroring the PyTorch/snntorch forward (full W)."""
    x = np.asarray(x, np.float32)
    F = np.asarray(F, np.float32)
    b_in = np.asarray(b_in, np.float32)
    W = np.asarray(W, np.float32)
    b_rec = np.asarray(b_rec, np.float32)
    D = np.asarray(D, np.float32)
    b_out = np.asarray(b_out, np.float32)
    T, N = x.shape[0], F.shape[0]
    mem1 = np.zeros((N,), np.float32)
    spk = np.zeros((N,), np.float32)
    mem2 = np.zeros((N,), np.float32)
    mem_out, spk_hist, mem1_hist = [], [], []
    for t in range(T):
        y = F[:, 0] * x[t, 0] + b_in
        rec = W @ spk + b_rec
        reset = (mem1 > 1.0).astype(np.float32)
        mem1 = (beta_v * mem1 + y + rec) * (1.0 - reset)
        spk = (mem1 > 1.0).astype(np.float32)
        mem2 = beta_x * mem2 + spk
        mem_out.append(D[0] @ mem2 + b_out[0])
        spk_hist.append(spk.copy())
        mem1_hist.append(mem1.copy())
    return (np.stack(mem_out).reshape(T, 1).astype(np.float32),
            np.stack(spk_hist), np.stack(mem1_hist))


if __name__ == "__main__":
    key = jax.random.PRNGKey(0)
    k1, k2, k3, k4, k5, k6 = jax.random.split(key, 6)

    N_hidden = 200   # module's N = 200 (kernel zero-pads lanes to 256)
    T = 16           # time steps

    # Deterministic synthetic parameters (shapes per the module's __init__).
    F = np.asarray(1.2 * jax.random.normal(k1, (N_hidden, 1)) / math.sqrt(N_hidden),
                   np.float32)                                     # input_layer.weight
    D = np.asarray(jax.random.normal(k2, (1, N_hidden)) / math.sqrt(N_hidden),
                   np.float32)                                     # output_layer.weight
    W = -(F @ D)                                                   # lif1.recurrent.weight (ref only)
    b_in = np.asarray(0.1 * jax.random.normal(k3, (N_hidden,)), np.float32)
    b_rec = np.asarray(0.1 * jax.random.normal(k4, (N_hidden,)), np.float32)
    b_out = np.asarray(0.1 * jax.random.normal(k5, (1,)), np.float32)
    beta_v = 0.8
    beta_x = 0.8

    # Input timeseries: [time_steps, variates=1] (single batch, per docstring).
    # TODO(synk): the original loads data/VanDerPol-1.csv via pandas; deterministic synthetic input used here.
    x = np.asarray(10.0 * jax.random.normal(k6, (T, 1)), np.float32)

    r_mem_out, r_spk, r_mem1 = ref_snn(x, F, b_in, W, b_rec, D, b_out, beta_v, beta_x)

    # Production config (chunk=128, single grid step for this small T).
    out_big = run_snn(x, F, b_in, b_rec, D, b_out, beta_v, beta_x)
    # Small-chunk config exercising the cross-chunk state carry (grid=(2,)).
    out_small = run_snn(x, F, b_in, b_rec, D, b_out, beta_v, beta_x, chunk=8, unroll=8)
    jax.block_until_ready((out_big, out_small))

    for mem_out, spk_h, mem1_h in (out_big, out_small):
        assert np.allclose(np.asarray(mem_out), r_mem_out, rtol=1e-3, atol=1e-4), "mem_output mismatch"
        assert np.allclose(np.asarray(spk_h), r_spk, rtol=1e-3, atol=1e-4), "spk_lc1 mismatch"
        assert np.allclose(np.asarray(mem1_h), r_mem1, rtol=1e-3, atol=1e-4), "mem_lc1 mismatch"

    print("KERNEL_OK")
</pallas_src>

<mosaic_0001>
module attributes {stable_mosaic.version = 11 : i64} {
  func.func @snn_chunk_kernel(%arg0: i32, %arg1: memref<128x1xf32, #tpu.memory_space<vmem>>, %arg2: memref<1x256xf32, #tpu.memory_space<vmem>>, %arg3: memref<1x256xf32, #tpu.memory_space<vmem>>, %arg4: memref<1x256xf32, #tpu.memory_space<vmem>>, %arg5: memref<128x1xf32, #tpu.memory_space<vmem>>, %arg6: memref<128x256xf32, #tpu.memory_space<vmem>>, %arg7: memref<128x256xf32, #tpu.memory_space<vmem>>, %arg8: memref<1x256xf32, #tpu.memory_space<vmem>>, %arg9: memref<1x1xf32, #tpu.memory_space<vmem>>) attributes {dimension_semantics = [#tpu.dimension_semantics<arbitrary>], iteration_bounds = array<i64: 1>, scalar_prefetch = 0 : i64, scratch_operands = 2 : i64, tpu.core_type = #tpu.core_type<tc>, window_params = [{transform_indices = @transform_0, window_bounds = array<i64: 128, 1>}, {pipeline_mode = #tpu.pipeline_mode<synchronous>, transform_indices = @transform_1, window_bounds = array<i64: 1, 256>}, {pipeline_mode = #tpu.pipeline_mode<synchronous>, transform_indices = @transform_2, window_bounds = array<i64: 1, 256>}, {pipeline_mode = #tpu.pipeline_mode<synchronous>, transform_indices = @transform_3, window_bounds = array<i64: 1, 256>}, {transform_indices = @transform_4, window_bounds = array<i64: 128, 1>}, {transform_indices = @transform_5, window_bounds = array<i64: 128, 256>}, {transform_indices = @transform_6, window_bounds = array<i64: 128, 256>}]} {
    %c0_i32 = arith.constant 0 : i32
    %0 = arith.cmpi eq, %arg0, %c0_i32 : i32
    %1 = arith.extui %0 : i1 to i32
    %c0_i32_0 = arith.constant 0 : i32
    %2 = arith.cmpi ne, %1, %c0_i32_0 : i32
    scf.if %2 {
      %cst_17 = arith.constant 0.000000e+00 : f32
      %19 = vector.broadcast %cst_17 : f32 to vector<1x256xf32>
      %c0_18 = arith.constant 0 : index
      %c0_19 = arith.constant 0 : index
      %20 = vector.load %arg8[%c0_18, %c0_19] : memref<1x256xf32, #tpu.memory_space<vmem>>, vector<1x256xf32>
      tpu.vector_store %arg8[%c0_18, %c0_19], %19 {strides = array<i32>} : memref<1x256xf32, #tpu.memory_space<vmem>>, vector<1x256xf32>,
      %cst_20 = arith.constant 0.000000e+00 : f32
      %21 = vector.broadcast %cst_20 : f32 to vector<1x1xf32>
      %c0_21 = arith.constant 0 : index
      %c0_22 = arith.constant 0 : index
      %22 = vector.load %arg9[%c0_21, %c0_22] : memref<1x1xf32, #tpu.memory_space<vmem>>, vector<1x1xf32>
      tpu.vector_store %arg9[%c0_21, %c0_22], %21 {strides = array<i32>} : memref<1x1xf32, #tpu.memory_space<vmem>>, vector<1x1xf32>,
    } else {
    }
    %c0 = arith.constant 0 : index
    %c0_1 = arith.constant 0 : index
    %3 = vector.load %arg2[%c0, %c0_1] : memref<1x256xf32, #tpu.memory_space<vmem>>, vector<1x256xf32>
    %c0_2 = arith.constant 0 : index
    %c0_3 = arith.constant 0 : index
    %4 = vector.load %arg3[%c0_2, %c0_3] : memref<1x256xf32, #tpu.memory_space<vmem>>, vector<1x256xf32>
    %c0_4 = arith.constant 0 : index
    %c0_5 = arith.constant 0 : index
    %5 = vector.load %arg4[%c0_4, %c0_5] : memref<1x256xf32, #tpu.memory_space<vmem>>, vector<1x256xf32>
    %c0_6 = arith.constant 0 : index
    %c0_7 = arith.constant 0 : index
    %6 = vector.load %arg8[%c0_6, %c0_7] : memref<1x256xf32, #tpu.memory_space<vmem>>, vector<1x256xf32>
    %cst = arith.constant 1.000000e+00 : f32
    %7 = vector.broadcast %cst : f32 to vector<1x256xf32>
    %8 = arith.cmpf ogt, %6, %7 : vector<1x256xf32>
    %9 = arith.extui %8 : vector<1x256xi1> to vector<1x256xi32>
    %10 = arith.sitofp %9 : vector<1x256xi32> to vector<1x256xf32>
    %11 = arith.mulf %5, %10 : vector<1x256xf32>
    %cst_8 = arith.constant dense<0.000000e+00> : vector<1xf32>
    %12 = vector.multi_reduction <add>, %11, %cst_8 [1] : vector<1x256xf32> to vector<1xf32>
    %13 = vector.shape_cast %12 : vector<1xf32> to vector<1x1xf32>
    %c0_9 = arith.constant 0 : index
    %c0_10 = arith.constant 0 : index
    %14 = vector.load %arg9[%c0_9, %c0_10] : memref<1x1xf32, #tpu.memory_space<vmem>>, vector<1x1xf32>
    %c0_i32_11 = arith.constant 0 : i32
    %c16_i32 = arith.constant 16 : i32
    %15 = arith.addi %c0_i32_11, %c16_i32 : i32
    %c1_i32 = arith.constant 1 : i32
    %16:4 = scf.for %arg10 = %c0_i32_11 to %15 step %c1_i32 iter_args(%arg11 = %6, %arg12 = %10, %arg13 = %13, %arg14 = %14) -> (vector<1x256xf32>, vector<1x256xf32>, vector<1x1xf32>, vector<1x1xf32>)  : i32 {
      %c8_i32 = arith.constant 8 : i32
      %19 = arith.muli %arg10, %c8_i32 : i32
      %20 = tpu.assume_multiple %19, 8 : i32
      %c0_i32_17 = arith.constant 0 : i32
      %21 = arith.addi %20, %c0_i32_17 : i32
      %22 = arith.index_cast %21 : i32 to index
      %c0_18 = arith.constant 0 : index
      %23 = vector.load %arg1[%22, %c0_18] : memref<128x1xf32, #tpu.memory_space<vmem>>, vector<1x1xf32>
      %24 = vector.broadcast %23 : vector<1x1xf32> to vector<1x256xf32>
      %25 = arith.mulf %24, %3 : vector<1x256xf32>
      %26 = arith.addf %25, %4 : vector<1x256xf32>
      %cst_19 = arith.constant 8.000000e-01 : f32
      %27 = vector.broadcast %cst_19 : f32 to vector<1x256xf32>
      %28 = arith.mulf %27, %arg11 : vector<1x256xf32>
      %29 = arith.addf %28, %26 : vector<1x256xf32>
      %30 = vector.broadcast %arg13 : vector<1x1xf32> to vector<1x256xf32>
      %31 = arith.mulf %30, %3 : vector<1x256xf32>
      %32 = arith.subf %29, %31 : vector<1x256xf32>
      %cst_20 = arith.constant 1.000000e+00 : f32
      %33 = vector.broadcast %cst_20 : f32 to vector<1x256xf32>
      %34 = arith.subf %33, %arg12 : vector<1x256xf32>
      %35 = arith.mulf %32, %34 : vector<1x256xf32>
      %cst_21 = arith.constant 1.000000e+00 : f32
      %36 = vector.broadcast %cst_21 : f32 to vector<1x256xf32>
      %37 = arith.cmpf ogt, %35, %36 : vector<1x256xf32>
      %38 = arith.extui %37 : vector<1x256xi1> to vector<1x256xi32>
      %39 = arith.sitofp %38 : vector<1x256xi32> to vector<1x256xf32>
      %40 = arith.mulf %5, %39 : vector<1x256xf32>
      %cst_22 = arith.constant dense<0.000000e+00> : vector<1xf32>
      %41 = vector.multi_reduction <add>, %40, %cst_22 [1] : vector<1x256xf32> to vector<1xf32>
      %42 = vector.shape_cast %41 : vector<1xf32> to vector<1x1xf32>
      %cst_23 = arith.constant 8.000000e-01 : f32
      %43 = vector.broadcast %cst_23 : f32 to vector<1x1xf32>
      %44 = arith.mulf %43, %arg14 : vector<1x1xf32>
      %45 = arith.addf %44, %42 : vector<1x1xf32>
      %46 = arith.index_cast %21 : i32 to index
      %c0_24 = arith.constant 0 : index
      %47 = vector.load %arg6[%46, %c0_24] : memref<128x256xf32, #tpu.memory_space<vmem>>, vector<1x256xf32>
      tpu.vector_store %arg6[%46, %c0_24], %39 {strides = array<i32>} : memref<128x256xf32, #tpu.memory_space<vmem>>, vector<1x256xf32>,
      %48 = arith.index_cast %21 : i32 to index
      %c0_25 = arith.constant 0 : index
      %49 = vector.load %arg7[%48, %c0_25] : memref<128x256xf32, #tpu.memory_space<vmem>>, vector<1x256xf32>
      tpu.vector_store %arg7[%48, %c0_25], %35 {strides = array<i32>} : memref<128x256xf32, #tpu.memory_space<vmem>>, vector<1x256xf32>,
      %50 = arith.index_cast %21 : i32 to index
      %c0_26 = arith.constant 0 : index
      %51 = vector.load %arg5[%50, %c0_26] : memref<128x1xf32, #tpu.memory_space<vmem>>, vector<1x1xf32>
      tpu.vector_store %arg5[%50, %c0_26], %45 {strides = array<i32>} : memref<128x1xf32, #tpu.memory_space<vmem>>, vector<1x1xf32>,
      %c1_i32_27 = arith.constant 1 : i32
      %52 = arith.addi %20, %c1_i32_27 : i32
      %53 = arith.index_cast %52 : i32 to index
      %c0_28 = arith.constant 0 : index
      %54 = vector.load %arg1[%53, %c0_28] : memref<128x1xf32, #tpu.memory_space<vmem>>, vector<1x1xf32>
      %55 = vector.broadcast %54 : vector<1x1xf32> to vector<1x256xf32>
      %56 = arith.mulf %55, %3 : vector<1x256xf32>
      %57 = arith.addf %56, %4 : vector<1x256xf32>
      %cst_29 = arith.constant 8.000000e-01 : f32
      %58 = vector.broadcast %cst_29 : f32 to vector<1x256xf32>
      %59 = arith.mulf %58, %35 : vector<1x256xf32>
      %60 = arith.addf %59, %57 : vector<1x256xf32>
      %61 = vector.broadcast %42 : vector<1x1xf32> to vector<1x256xf32>
      %62 = arith.mulf %61, %3 : vector<1x256xf32>
      %63 = arith.subf %60, %62 : vector<1x256xf32>
      %cst_30 = arith.constant 1.000000e+00 : f32
      %64 = vector.broadcast %cst_30 : f32 to vector<1x256xf32>
      %65 = arith.subf %64, %39 : vector<1x256xf32>
      %66 = arith.mulf %63, %65 : vector<1x256xf32>
      %cst_31 = arith.constant 1.000000e+00 : f32
      %67 = vector.broadcast %cst_31 : f32 to vector<1x256xf32>
      %68 = arith.cmpf ogt, %66, %67 : vector<1x256xf32>
      %69 = arith.extui %68 : vector<1x256xi1> to vector<1x256xi32>
      %70 = arith.sitofp %69 : vector<1x256xi32> to vector<1x256xf32>
      %71 = arith.mulf %5, %70 : vector<1x256xf32>
      %cst_32 = arith.constant dense<0.000000e+00> : vector<1xf32>
      %72 = vector.multi_reduction <add>, %71, %cst_32 [1] : vector<1x256xf32> to vector<1xf32>
      %73 = vector.shape_cast %72 : vector<1xf32> to vector<1x1xf32>
      %cst_33 = arith.constant 8.000000e-01 : f32
      %74 = vector.broadcast %cst_33 : f32 to vector<1x1xf32>
      %75 = arith.mulf %74, %45 : vector<1x1xf32>
      %76 = arith.addf %75, %73 : vector<1x1xf32>
      %77 = arith.index_cast %52 : i32 to index
      %c0_34 = arith.constant 0 : index
      %78 = vector.load %arg6[%77, %c0_34] : memref<128x256xf32, #tpu.memory_space<vmem>>, vector<1x256xf32>
      tpu.vector_store %arg6[%77, %c0_34], %70 {strides = array<i32>} : memref<128x256xf32, #tpu.memory_space<vmem>>, vector<1x256xf32>,
      %79 = arith.index_cast %52 : i32 to index
      %c0_35 = arith.constant 0 : index
      %80 = vector.load %arg7[%79, %c0_35] : memref<128x256xf32, #tpu.memory_space<vmem>>, vector<1x256xf32>
      tpu.vector_store %arg7[%79, %c0_35], %66 {strides = array<i32>} : memref<128x256xf32, #tpu.memory_space<vmem>>, vector<1x256xf32>,
      %81 = arith.index_cast %52 : i32 to index
      %c0_36 = arith.constant 0 : index
      %82 = vector.load %arg5[%81, %c0_36] : memref<128x1xf32, #tpu.memory_space<vmem>>, vector<1x1xf32>
      tpu.vector_store %arg5[%81, %c0_36], %76 {strides = array<i32>} : memref<128x1xf32, #tpu.memory_space<vmem>>, vector<1x1xf32>,
      %c2_i32 = arith.constant 2 : i32
      %83 = arith.addi %20, %c2_i32 : i32
      %84 = arith.index_cast %83 : i32 to index
      %c0_37 = arith.constant 0 : index
      %85 = vector.load %arg1[%84, %c0_37] : memref<128x1xf32, #tpu.memory_space<vmem>>, vector<1x1xf32>
      %86 = vector.broadcast %85 : vector<1x1xf32> to vector<1x256xf32>
      %87 = arith.mulf %86, %3 : vector<1x256xf32>
      %88 = arith.addf %87, %4 : vector<1x256xf32>
      %cst_38 = arith.constant 8.000000e-01 : f32
      %89 = vector.broadcast %cst_38 : f32 to vector<1x256xf32>
      %90 = arith.mulf %89, %66 : vector<1x256xf32>
      %91 = arith.addf %90, %88 : vector<1x256xf32>
      %92 = vector.broadcast %73 : vector<1x1xf32> to vector<1x256xf32>
      %93 = arith.mulf %92, %3 : vector<1x256xf32>
      %94 = arith.subf %91, %93 : vector<1x256xf32>
      %cst_39 = arith.constant 1.000000e+00 : f32
      %95 = vector.broadcast %cst_39 : f32 to vector<1x256xf32>
      %96 = arith.subf %95, %70 : vector<1x256xf32>
      %97 = arith.mulf %94, %96 : vector<1x256xf32>
      %cst_40 = arith.constant 1.000000e+00 : f32
      %98 = vector.broadcast %cst_40 : f32 to vector<1x256xf32>
      %99 = arith.cmpf ogt, %97, %98 : vector<1x256xf32>
      %100 = arith.extui %99 : vector<1x256xi1> to vector<1x256xi32>
      %101 = arith.sitofp %100 : vector<1x256xi32> to vector<1x256xf32>
      %102 = arith.mulf %5, %101 : vector<1x256xf32>
      %cst_41 = arith.constant dense<0.000000e+00> : vector<1xf32>
      %103 = vector.multi_reduction <add>, %102, %cst_41 [1] : vector<1x256xf32> to vector<1xf32>
      %104 = vector.shape_cast %103 : vector<1xf32> to vector<1x1xf32>
      %cst_42 = arith.constant 8.000000e-01 : f32
      %105 = vector.broadcast %cst_42 : f32 to vector<1x1xf32>
      %106 = arith.mulf %105, %76 : vector<1x1xf32>
      %107 = arith.addf %106, %104 : vector<1x1xf32>
      %108 = arith.index_cast %83 : i32 to index
      %c0_43 = arith.constant 0 : index
      %109 = vector.load %arg6[%108, %c0_43] : memref<128x256xf32, #tpu.memory_space<vmem>>, vector<1x256xf32>
      tpu.vector_store %arg6[%108, %c0_43], %101 {strides = array<i32>} : memref<128x256xf32, #tpu.memory_space<vmem>>, vector<1x256xf32>,
      %110 = arith.index_cast %83 : i32 to index
      %c0_44 = arith.constant 0 : index
      %111 = vector.load %arg7[%110, %c0_44] : memref<128x256xf32, #tpu.memory_space<vmem>>, vector<1x256xf32>
      tpu.vector_store %arg7[%110, %c0_44], %97 {strides = array<i32>} : memref<128x256xf32, #tpu.memory_space<vmem>>, vector<1x256xf32>,
      %112 = arith.index_cast %83 : i32 to index
      %c0_45 = arith.constant 0 : index
      %113 = vector.load %arg5[%112, %c0_45] : memref<128x1xf32, #tpu.memory_space<vmem>>, vector<1x1xf32>
      tpu.vector_store %arg5[%112, %c0_45], %107 {strides = array<i32>} : memref<128x1xf32, #tpu.memory_space<vmem>>, vector<1x1xf32>,
      %c3_i32 = arith.constant 3 : i32
      %114 = arith.addi %20, %c3_i32 : i32
      %115 = arith.index_cast %114 : i32 to index
      %c0_46 = arith.constant 0 : index
      %116 = vector.load %arg1[%115, %c0_46] : memref<128x1xf32, #tpu.memory_space<vmem>>, vector<1x1xf32>
      %117 = vector.broadcast %116 : vector<1x1xf32> to vector<1x256xf32>
      %118 = arith.mulf %117, %3 : vector<1x256xf32>
      %119 = arith.addf %118, %4 : vector<1x256xf32>
      %cst_47 = arith.constant 8.000000e-01 : f32
      %120 = vector.broadcast %cst_47 : f32 to vector<1x256xf32>
      %121 = arith.mulf %120, %97 : vector<1x256xf32>
      %122 = arith.addf %121, %119 : vector<1x256xf32>
      %123 = vector.broadcast %104 : vector<1x1xf32> to vector<1x256xf32>
      %124 = arith.mulf %123, %3 : vector<1x256xf32>
      %125 = arith.subf %122, %124 : vector<1x256xf32>
      %cst_48 = arith.constant 1.000000e+00 : f32
      %126 = vector.broadcast %cst_48 : f32 to vector<1x256xf32>
      %127 = arith.subf %126, %101 : vector<1x256xf32>
      %128 = arith.mulf %125, %127 : vector<1x256xf32>
      %cst_49 = arith.constant 1.000000e+00 : f32
      %129 = vector.broadcast %cst_49 : f32 to vector<1x256xf32>
      %130 = arith.cmpf ogt, %128, %129 : vector<1x256xf32>
      %131 = arith.extui %130 : vector<1x256xi1> to vector<1x256xi32>
      %132 = arith.sitofp %131 : vector<1x256xi32> to vector<1x256xf32>
      %133 = arith.mulf %5, %132 : vector<1x256xf32>
      %cst_50 = arith.constant dense<0.000000e+00> : vector<1xf32>
      %134 = vector.multi_reduction <add>, %133, %cst_50 [1] : vector<1x256xf32> to vector<1xf32>
      %135 = vector.shape_cast %134 : vector<1xf32> to vector<1x1xf32>
      %cst_51 = arith.constant 8.000000e-01 : f32
      %136 = vector.broadcast %cst_51 : f32 to vector<1x1xf32>
      %137 = arith.mulf %136, %107 : vector<1x1xf32>
      %138 = arith.addf %137, %135 : vector<1x1xf32>
      %139 = arith.index_cast %114 : i32 to index
      %c0_52 = arith.constant 0 : index
      %140 = vector.load %arg6[%139, %c0_52] : memref<128x256xf32, #tpu.memory_space<vmem>>, vector<1x256xf32>
      tpu.vector_store %arg6[%139, %c0_52], %132 {strides = array<i32>} : memref<128x256xf32, #tpu.memory_space<vmem>>, vector<1x256xf32>,
      %141 = arith.index_cast %114 : i32 to index
      %c0_53 = arith.constant 0 : index
      %142 = vector.load %arg7[%141, %c0_53] : memref<128x256xf32, #tpu.memory_space<vmem>>, vector<1x256xf32>
      tpu.vector_store %arg7[%141, %c0_53], %128 {strides = array<i32>} : memref<128x256xf32, #tpu.memory_space<vmem>>, vector<1x256xf32>,
      %143 = arith.index_cast %114 : i32 to index
      %c0_54 = arith.constant 0 : index
      %144 = vector.load %arg5[%143, %c0_54] : memref<128x1xf32, #tpu.memory_space<vmem>>, vector<1x1xf32>
      tpu.vector_store %arg5[%143, %c0_54], %138 {strides = array<i32>} : memref<128x1xf32, #tpu.memory_space<vmem>>, vector<1x1xf32>,
      %c4_i32 = arith.constant 4 : i32
      %145 = arith.addi %20, %c4_i32 : i32
      %146 = arith.index_cast %145 : i32 to index
      %c0_55 = arith.constant 0 : index
      %147 = vector.load %arg1[%146, %c0_55] : memref<128x1xf32, #tpu.memory_space<vmem>>, vector<1x1xf32>
      %148 = vector.broadcast %147 : vector<1x1xf32> to vector<1x256xf32>
      %149 = arith.mulf %148, %3 : vector<1x256xf32>
      %150 = arith.addf %149, %4 : vector<1x256xf32>
      %cst_56 = arith.constant 8.000000e-01 : f32
      %151 = vector.broadcast %cst_56 : f32 to vector<1x256xf32>
      %152 = arith.mulf %151, %128 : vector<1x256xf32>
      %153 = arith.addf %152, %150 : vector<1x256xf32>
      %154 = vector.broadcast %135 : vector<1x1xf32> to vector<1x256xf32>
      %155 = arith.mulf %154, %3 : vector<1x256xf32>
      %156 = arith.subf %153, %155 : vector<1x256xf32>
      %cst_57 = arith.constant 1.000000e+00 : f32
      %157 = vector.broadcast %cst_57 : f32 to vector<1x256xf32>
      %158 = arith.subf %157, %132 : vector<1x256xf32>
      %159 = arith.mulf %156, %158 : vector<1x256xf32>
      %cst_58 = arith.constant 1.000000e+00 : f32
      %160 = vector.broadcast %cst_58 : f32 to vector<1x256xf32>
      %161 = arith.cmpf ogt, %159, %160 : vector<1x256xf32>
      %162 = arith.extui %161 : vector<1x256xi1> to vector<1x256xi32>
      %163 = arith.sitofp %162 : vector<1x256xi32> to vector<1x256xf32>
      %164 = arith.mulf %5, %163 : vector<1x256xf32>
      %cst_59 = arith.constant dense<0.000000e+00> : vector<1xf32>
      %165 = vector.multi_reduction <add>, %164, %cst_59 [1] : vector<1x256xf32> to vector<1xf32>
      %166 = vector.shape_cast %165 : vector<1xf32> to vector<1x1xf32>
      %cst_60 = arith.constant 8.000000e-01 : f32
      %167 = vector.broadcast %cst_60 : f32 to vector<1x1xf32>
      %168 = arith.mulf %167, %138 : vector<1x1xf32>
      %169 = arith.addf %168, %166 : vector<1x1xf32>
      %170 = arith.index_cast %145 : i32 to index
      %c0_61 = arith.constant 0 : index
      %171 = vector.load %arg6[%170, %c0_61] : memref<128x256xf32, #tpu.memory_space<vmem>>, vector<1x256xf32>
      tpu.vector_store %arg6[%170, %c0_61], %163 {strides = array<i32>} : memref<128x256xf32, #tpu.memory_space<vmem>>, vector<1x256xf32>,
      %172 = arith.index_cast %145 : i32 to index
      %c0_62 = arith.constant 0 : index
      %173 = vector.load %arg7[%172, %c0_62] : memref<128x256xf32, #tpu.memory_space<vmem>>, vector<1x256xf32>
      tpu.vector_store %arg7[%172, %c0_62], %159 {strides = array<i32>} : memref<128x256xf32, #tpu.memory_space<vmem>>, vector<1x256xf32>,
      %174 = arith.index_cast %145 : i32 to index
      %c0_63 = arith.constant 0 : index
      %175 = vector.load %arg5[%174, %c0_63] : memref<128x1xf32, #tpu.memory_space<vmem>>, vector<1x1xf32>
      tpu.vector_store %arg5[%174, %c0_63], %169 {strides = array<i32>} : memref<128x1xf32, #tpu.memory_space<vmem>>, vector<1x1xf32>,
      %c5_i32 = arith.constant 5 : i32
      %176 = arith.addi %20, %c5_i32 : i32
      %177 = arith.index_cast %176 : i32 to index
      %c0_64 = arith.constant 0 : index
      %178 = vector.load %arg1[%177, %c0_64] : memref<128x1xf32, #tpu.memory_space<vmem>>, vector<1x1xf32>
      %179 = vector.broadcast %178 : vector<1x1xf32> to vector<1x256xf32>
      %180 = arith.mulf %179, %3 : vector<1x256xf32>
      %181 = arith.addf %180, %4 : vector<1x256xf32>
      %cst_65 = arith.constant 8.000000e-01 : f32
      %182 = vector.broadcast %cst_65 : f32 to vector<1x256xf32>
      %183 = arith.mulf %182, %159 : vector<1x256xf32>
      %184 = arith.addf %183, %181 : vector<1x256xf32>
      %185 = vector.broadcast %166 : vector<1x1xf32> to vector<1x256xf32>
      %186 = arith.mulf %185, %3 : vector<1x256xf32>
      %187 = arith.subf %184, %186 : vector<1x256xf32>
      %cst_66 = arith.constant 1.000000e+00 : f32
      %188 = vector.broadcast %cst_66 : f32 to vector<1x256xf32>
      %189 = arith.subf %188, %163 : vector<1x256xf32>
      %190 = arith.mulf %187, %189 : vector<1x256xf32>
      %cst_67 = arith.constant 1.000000e+00 : f32
      %191 = vector.broadcast %cst_67 : f32 to vector<1x256xf32>
      %192 = arith.cmpf ogt, %190, %191 : vector<1x256xf32>
      %193 = arith.extui %192 : vector<1x256xi1> to vector<1x256xi32>
      %194 = arith.sitofp %193 : vector<1x256xi32> to vector<1x256xf32>
      %195 = arith.mulf %5, %194 : vector<1x256xf32>
      %cst_68 = arith.constant dense<0.000000e+00> : vector<1xf32>
      %196 = vector.multi_reduction <add>, %195, %cst_68 [1] : vector<1x256xf32> to vector<1xf32>
      %197 = vector.shape_cast %196 : vector<1xf32> to vector<1x1xf32>
      %cst_69 = arith.constant 8.000000e-01 : f32
      %198 = vector.broadcast %cst_69 : f32 to vector<1x1xf32>
      %199 = arith.mulf %198, %169 : vector<1x1xf32>
      %200 = arith.addf %199, %197 : vector<1x1xf32>
      %201 = arith.index_cast %176 : i32 to index
      %c0_70 = arith.constant 0 : index
      %202 = vector.load %arg6[%201, %c0_70] : memref<128x256xf32, #tpu.memory_space<vmem>>, vector<1x256xf32>
      tpu.vector_store %arg6[%201, %c0_70], %194 {strides = array<i32>} : memref<128x256xf32, #tpu.memory_space<vmem>>, vector<1x256xf32>,
      %203 = arith.index_cast %176 : i32 to index
      %c0_71 = arith.constant 0 : index
      %204 = vector.load %arg7[%203, %c0_71] : memref<128x256xf32, #tpu.memory_space<vmem>>, vector<1x256xf32>
      tpu.vector_store %arg7[%203, %c0_71], %190 {strides = array<i32>} : memref<128x256xf32, #tpu.memory_space<vmem>>, vector<1x256xf32>,
      %205 = arith.index_cast %176 : i32 to index
      %c0_72 = arith.constant 0 : index
      %206 = vector.load %arg5[%205, %c0_72] : memref<128x1xf32, #tpu.memory_space<vmem>>, vector<1x1xf32>
      tpu.vector_store %arg5[%205, %c0_72], %200 {strides = array<i32>} : memref<128x1xf32, #tpu.memory_space<vmem>>, vector<1x1xf32>,
      %c6_i32 = arith.constant 6 : i32
      %207 = arith.addi %20, %c6_i32 : i32
      %208 = arith.index_cast %207 : i32 to index
      %c0_73 = arith.constant 0 : index
      %209 = vector.load %arg1[%208, %c0_73] : memref<128x1xf32, #tpu.memory_space<vmem>>, vector<1x1xf32>
      %210 = vector.broadcast %209 : vector<1x1xf32> to vector<1x256xf32>
      %211 = arith.mulf %210, %3 : vector<1x256xf32>
      %212 = arith.addf %211, %4 : vector<1x256xf32>
      %cst_74 = arith.constant 8.000000e-01 : f32
      %213 = vector.broadcast %cst_74 : f32 to vector<1x256xf32>
      %214 = arith.mulf %213, %190 : vector<1x256xf32>
      %215 = arith.addf %214, %212 : vector<1x256xf32>
      %216 = vector.broadcast %197 : vector<1x1xf32> to vector<1x256xf32>
      %217 = arith.mulf %216, %3 : vector<1x256xf32>
      %218 = arith.subf %215, %217 : vector<1x256xf32>
      %cst_75 = arith.constant 1.000000e+00 : f32
      %219 = vector.broadcast %cst_75 : f32 to vector<1x256xf32>
      %220 = arith.subf %219, %194 : vector<1x256xf32>
      %221 = arith.mulf %218, %220 : vector<1x256xf32>
      %cst_76 = arith.constant 1.000000e+00 : f32
      %222 = vector.broadcast %cst_76 : f32 to vector<1x256xf32>
      %223 = arith.cmpf ogt, %221, %222 : vector<1x256xf32>
      %224 = arith.extui %223 : vector<1x256xi1> to vector<1x256xi32>
      %225 = arith.sitofp %224 : vector<1x256xi32> to vector<1x256xf32>
      %226 = arith.mulf %5, %225 : vector<1x256xf32>
      %cst_77 = arith.constant dense<0.000000e+00> : vector<1xf32>
      %227 = vector.multi_reduction <add>, %226, %cst_77 [1] : vector<1x256xf32> to vector<1xf32>
      %228 = vector.shape_cast %227 : vector<1xf32> to vector<1x1xf32>
      %cst_78 = arith.constant 8.000000e-01 : f32
      %229 = vector.broadcast %cst_78 : f32 to vector<1x1xf32>
      %230 = arith.mulf %229, %200 : vector<1x1xf32>
      %231 = arith.addf %230, %228 : vector<1x1xf32>
      %232 = arith.index_cast %207 : i32 to index
      %c0_79 = arith.constant 0 : index
      %233 = vector.load %arg6[%232, %c0_79] : memref<128x256xf32, #tpu.memory_space<vmem>>, vector<1x256xf32>
      tpu.vector_store %arg6[%232, %c0_79], %225 {strides = array<i32>} : memref<128x256xf32, #tpu.memory_space<vmem>>, vector<1x256xf32>,
      %234 = arith.index_cast %207 : i32 to index
      %c0_80 = arith.constant 0 : index
      %235 = vector.load %arg7[%234, %c0_80] : memref<128x256xf32, #tpu.memory_space<vmem>>, vector<1x256xf32>
      tpu.vector_store %arg7[%234, %c0_80], %221 {strides = array<i32>} : memref<128x256xf32, #tpu.memory_space<vmem>>, vector<1x256xf32>,
      %236 = arith.index_cast %207 : i32 to index
      %c0_81 = arith.constant 0 : index
      %237 = vector.load %arg5[%236, %c0_81] : memref<128x1xf32, #tpu.memory_space<vmem>>, vector<1x1xf32>
      tpu.vector_store %arg5[%236, %c0_81], %231 {strides = array<i32>} : memref<128x1xf32, #tpu.memory_space<vmem>>, vector<1x1xf32>,
      %c7_i32 = arith.constant 7 : i32
      %238 = arith.addi %20, %c7_i32 : i32
      %239 = arith.index_cast %238 : i32 to index
      %c0_82 = arith.constant 0 : index
      %240 = vector.load %arg1[%239, %c0_82] : memref<128x1xf32, #tpu.memory_space<vmem>>, vector<1x1xf32>
      %241 = vector.broadcast %240 : vector<1x1xf32> to vector<1x256xf32>
      %242 = arith.mulf %241, %3 : vector<1x256xf32>
      %243 = arith.addf %242, %4 : vector<1x256xf32>
      %cst_83 = arith.constant 8.000000e-01 : f32
      %244 = vector.broadcast %cst_83 : f32 to vector<1x256xf32>
      %245 = arith.mulf %244, %221 : vector<1x256xf32>
      %246 = arith.addf %245, %243 : vector<1x256xf32>
      %247 = vector.broadcast %228 : vector<1x1xf32> to vector<1x256xf32>
      %248 = arith.mulf %247, %3 : vector<1x256xf32>
      %249 = arith.subf %246, %248 : vector<1x256xf32>
      %cst_84 = arith.constant 1.000000e+00 : f32
      %250 = vector.broadcast %cst_84 : f32 to vector<1x256xf32>
      %251 = arith.subf %250, %225 : vector<1x256xf32>
      %252 = arith.mulf %249, %251 : vector<1x256xf32>
      %cst_85 = arith.constant 1.000000e+00 : f32
      %253 = vector.broadcast %cst_85 : f32 to vector<1x256xf32>
      %254 = arith.cmpf ogt, %252, %253 : vector<1x256xf32>
      %255 = arith.extui %254 : vector<1x256xi1> to vector<1x256xi32>
      %256 = arith.sitofp %255 : vector<1x256xi32> to vector<1x256xf32>
      %257 = arith.mulf %5, %256 : vector<1x256xf32>
      %cst_86 = arith.constant dense<0.000000e+00> : vector<1xf32>
      %258 = vector.multi_reduction <add>, %257, %cst_86 [1] : vector<1x256xf32> to vector<1xf32>
      %259 = vector.shape_cast %258 : vector<1xf32> to vector<1x1xf32>
      %cst_87 = arith.constant 8.000000e-01 : f32
      %260 = vector.broadcast %cst_87 : f32 to vector<1x1xf32>
      %261 = arith.mulf %260, %231 : vector<1x1xf32>
      %262 = arith.addf %261, %259 : vector<1x1xf32>
      %263 = arith.index_cast %238 : i32 to index
      %c0_88 = arith.constant 0 : index
      %264 = vector.load %arg6[%263, %c0_88] : memref<128x256xf32, #tpu.memory_space<vmem>>, vector<1x256xf32>
      tpu.vector_store %arg6[%263, %c0_88], %256 {strides = array<i32>} : memref<128x256xf32, #tpu.memory_space<vmem>>, vector<1x256xf32>,
      %265 = arith.index_cast %238 : i32 to index
      %c0_89 = arith.constant 0 : index
      %266 = vector.load %arg7[%265, %c0_89] : memref<128x256xf32, #tpu.memory_space<vmem>>, vector<1x256xf32>
      tpu.vector_store %arg7[%265, %c0_89], %252 {strides = array<i32>} : memref<128x256xf32, #tpu.memory_space<vmem>>, vector<1x256xf32>,
      %267 = arith.index_cast %238 : i32 to index
      %c0_90 = arith.constant 0 : index
      %268 = vector.load %arg5[%267, %c0_90] : memref<128x1xf32, #tpu.memory_space<vmem>>, vector<1x1xf32>
      tpu.vector_store %arg5[%267, %c0_90], %262 {strides = array<i32>} : memref<128x1xf32, #tpu.memory_space<vmem>>, vector<1x1xf32>,
      scf.yield %252, %256, %259, %262 : vector<1x256xf32>, vector<1x256xf32>, vector<1x1xf32>, vector<1x1xf32>
    }
    %c16_i32_12 = arith.constant 16 : i32
    %c0_13 = arith.constant 0 : index
    %c0_14 = arith.constant 0 : index
    %17 = vector.load %arg8[%c0_13, %c0_14] : memref<1x256xf32, #tpu.memory_space<vmem>>, vector<1x256xf32>
    tpu.vector_store %arg8[%c0_13, %c0_14], %16#0 {strides = array<i32>} : memref<1x256xf32, #tpu.memory_space<vmem>>, vector<1x256xf32>,
    %c0_15 = arith.constant 0 : index
    %c0_16 = arith.constant 0 : index
    %18 = vector.load %arg9[%c0_15, %c0_16] : memref<1x1xf32, #tpu.memory_space<vmem>>, vector<1x1xf32>
    tpu.vector_store %arg9[%c0_15, %c0_16], %16#3 {strides = array<i32>} : memref<1x1xf32, #tpu.memory_space<vmem>>, vector<1x1xf32>,
    return
  }
  func.func @transform_0(%arg0: i32) -> (i32, i32) {
    %c0_i32 = arith.constant 0 : i32
    %c0_i32_0 = arith.constant 0 : i32
    return %arg0, %c0_i32 : i32, i32
  }
  func.func @transform_1(%arg0: i32) -> (i32, i32) {
    %c0_i32 = arith.constant 0 : i32
    %c0_i32_0 = arith.constant 0 : i32
    %c0_i32_1 = arith.constant 0 : i32
    return %c0_i32, %c0_i32_0 : i32, i32
  }
  func.func @transform_2(%arg0: i32) -> (i32, i32) {
    %c0_i32 = arith.constant 0 : i32
    %c0_i32_0 = arith.constant 0 : i32
    %c0_i32_1 = arith.constant 0 : i32
    return %c0_i32, %c0_i32_0 : i32, i32
  }
  func.func @transform_3(%arg0: i32) -> (i32, i32) {
    %c0_i32 = arith.constant 0 : i32
    %c0_i32_0 = arith.constant 0 : i32
    %c0_i32_1 = arith.constant 0 : i32
    return %c0_i32, %c0_i32_0 : i32, i32
  }
  func.func @transform_4(%arg0: i32) -> (i32, i32) {
    %c0_i32 = arith.constant 0 : i32
    %c0_i32_0 = arith.constant 0 : i32
    return %arg0, %c0_i32 : i32, i32
  }
  func.func @transform_5(%arg0: i32) -> (i32, i32) {
    %c0_i32 = arith.constant 0 : i32
    %c0_i32_0 = arith.constant 0 : i32
    return %arg0, %c0_i32 : i32, i32
  }
  func.func @transform_6(%arg0: i32) -> (i32, i32) {
    %c0_i32 = arith.constant 0 : i32
    %c0_i32_0 = arith.constant 0 : i32
    return %arg0, %c0_i32 : i32, i32
  }
}

</mosaic_0001>

<bundles_post_ra>
// kernel: tpu_custom_call.1
= control target key start
LH: loop header
LB: loop body
LE: loop exit
PB: predicated region body
PF: predicated region fallthrough
CT: control target
= control target key end

     0   :  { %12 = vsyncpa [#allocation5], 0  ;;  %s1209_s0 = inlined_call_operand.vmem [shape: f32[128,1], index: 0, kind: input, shape index: {}]   ;;  %s1210_s1 = inlined_call_operand.vmem [shape: f32[1,256], index: 1, kind: input, shape index: {}]   ;;  %s1211_s2 = inlined_call_operand.vmem [shape: f32[1,256], index: 2, kind: input, shape index: {}]   ;;  %s1212_s3 = inlined_call_operand.vmem [shape: f32[1,256], index: 3, kind: input, shape index: {}]   ;;  %s1213_s4 = inlined_call_operand.vmem [shape: f32[128,1], index: 4, kind: output, shape index: {0}]   ;;  %s1214_s5 = inlined_call_operand.hbm [shape: f32[128,256], index: 5, kind: output, shape index: {1}]   ;;  %s1215_s6 = inlined_call_operand.hbm [shape: f32[128,256], index: 6, kind: output, shape index: {2}]  }
   0x1   :  { %13 = vsyncpa [#allocation7], 0  ;;  %v26_v0 = vlaneseq  ;;  %vm31_vm0 = vcmask 0   ;;  %v963_v1 = vld [vmem:[%s1210_s1] sm:$0x3]  ;;  %v918_v2 = vmov 0.0  }
   0x2   :  { %32 = vst.msk [vmem:[#allocation3] sm:$0x1] %vm31_vm0, %v918_v2  ;;  %v969_v3 = vld [vmem:[%s1211_s2] sm:$0x3]  ;;  %vm46_vm3 = vcmask 1040384   ;;  %s993_s1 = smov 0  }
   0x3   :  { %vm971_vm1 = vcmp.lt.s32.totalorder %v26_v0, 256  ;;  %v980_v6 = vld [vmem:[%s1212_s3] sm:$0x3] }
   0x4   :  { %30 = vst.msk [vmem:[#allocation2] sm:$0x3] %vm971_vm1, %v918_v2 }
   0x9   :  { %v52_v5 = vld [vmem:[#allocation3] sm:$0x1]  }
   0xb   :  { %v36_v7 = vld [vmem:[#allocation2] sm:$0x3]  }
   0xc   :  { %vm37_vm2 = vcmp.gt.f32.partialorder %v36_v7, 1.0 }
   0xd   :  { %v712_v8 = vsel %vm37_vm2, 1.0, %v918_v2  }
   0xe   :  { %v40_v9 = vmul.f32 %v712_v8, %v980_v6 }
  0x10   :  { %v42_v10 = vperm.slane %v40_v9, 0  ;;  %v43_v11 = vperm.slane %v40_v9, 1 }
  0x12   :  { %v47_v12 = vsel %vm46_vm3, %v42_v10, 0.0  ;;  %v48_v13 = vsel %vm46_vm3, %v43_v11, 0.0 }
  0x13   :  { %v49_v14 = vadd.f32 %v48_v13, %v47_v12 }
  0x15   :  { %50 = vadd.xlane.f32.xlu0 %v49_v14 }
  0x88   :  { %v51_v15 = vpop.xlane.xlu0 %50  }
  0x89 LB: > { %v919_v16 = vmov 0   ;;  %s1003_s2 = sshll.u32 %s916_s1, 3  ;;  %v1014_v19 = vperm.slane %v963_v1, 0  ;;  %v1017_v20 = vperm.slane %v963_v1, 1  ;;  %v1020_v21 = vperm.slane %v969_v3, 1  ;;  %s58_s1 = sadd.s32 1, %s916_s1   ;;  %s916_s1 = sphi %s993_s1, %s58_s1   ;;  %v912_v7 = vphi %v36_v7, %v1219_v7   ;;  %v908_v8 = vphi %v712_v8, %v762_v8   ;;  %v904_v15 = vphi %v51_v15, %v538_v15   ;;  %v900_v5 = vphi %v52_v5, %v1218_v5  }
  0x8a   : > { %823 = vset.pattern.permute.xlu0 %v919_v16  ;;  %824 = vset.pattern.permute.xlu1 %v919_v16  ;;  %s1009_s28 = scalar_lea.vmem %s1209_s0, %s1003_s2  ;;  %v1024_v24 = vperm.slane %v969_v3, 0  ;;  %v85_v30 = vmul.f32 0.8, %v912_v7  ;;  %s118_s29 = sshra.s32 %s1003_s2, 3  ;;  %v100_v36 = vsub.f32 1.0, %v908_v8  ;;  %v920_v39 = vmov 0.0  }
  0x8b   : > { %825 = vset.pattern.permute.xlu2 %v919_v16  ;;  %v65_v17 = vld [vmem:[%s1009_s28] sm:$0x1]  ;;  %v719_v18 = vld [vmem:[%s1009_s28 + $0x1] sm:$0x1]  ;;  %v93_v22 = vmul.f32 %v904_v15, %v1017_v20  ;;  %v92_v28 = vmul.f32 %v904_v15, %v1014_v19  ;;  %s767_s30 = sshll.u32 %s118_s29, 4  ;;  %s136_s9 = sadd.s32 1, %s1003_s2 }
  0x8c   : > { %68 = vperm.xlu0 %823, %v65_v17   ;;  %s130_s7 = scalar_lea.vmem [#allocation6], %s767_s30  ;;  %s122_s8 = scalar_lea.vmem [#allocation4], %s767_s30  ;;  %v726_v47 = vld [vmem:[%s1009_s28 + $0x2] sm:$0x1]  ;;  %v116_v53 = vmul.f32 0.8, %v900_v5 }
  0x8d   : > { %v96_v29 = vrot.slane %v93_v22, 7  ;;  %s181_s10 = sshra.s32 %s136_s9, 3  ;;  %s1052_s13 = scalar_lea.vmem %s1213_s4, %s1003_s2  ;;  %v733_v14 = vld [vmem:[%s1009_s28 + $0x3] sm:$0x1]  ;;  %v740_v16 = vld [vmem:[%s1009_s28 + $0x4] sm:$0x1] }
  0x8e   : > { %s184_s14 = sand.u32 7, %s136_s9  ;;  %s769_s15 = sshll.u32 %s181_s10, 4 }
  0x8f   : > { %v97_v34 = vsel %vm46_vm3, %v92_v28, %v96_v29  ;;  %s187_s16 = sadd.s32 %s769_s15, %s184_s14  ;;  %s196_s19 = sadd.s32 2, %s1003_s2 }
  0x90   : > { %s191_s17 = scalar_lea.vmem [#allocation6], %s187_s16  ;;  %s188_s18 = scalar_lea.vmem [#allocation4], %s187_s16 }
  0x91   : > { %s241_s20 = sshra.s32 %s196_s19, 3  ;;  %s244_s21 = sand.u32 7, %s196_s19 }
  0x92   : > { %s770_s22 = sshll.u32 %s241_s20, 4  ;;  %s256_s26 = sadd.s32 3, %s1003_s2 }
  0x93   : > { %s247_s23 = sadd.s32 %s770_s22, %s244_s21  ;;  %s301_s3 = sshra.s32 %s256_s26, 3 }
  0x94   : > { %141 = vperm.xlu0 %823, %v719_v18   ;;  %s251_s24 = scalar_lea.vmem [#allocation6], %s247_s23  ;;  %s248_s25 = scalar_lea.vmem [#allocation4], %s247_s23 }
  0x95   : > { %s304_s27 = sand.u32 7, %s256_s26  ;;  %s376_s16 = sadd.s32 5, %s1003_s2 }
  0x96   : > { %s436_s23 = sadd.s32 6, %s1003_s2  ;;  %p55_p0 = scmp.ge.s32.totalorder %s58_s1, 16  }
  0x97   :  { %s584_s0 = sshll.u32 (%p55_p0), %s1215_s6, 4  ;;  %s585_s0 = int_to_ptr.hbm [resolvable:$true] %s584_s0 }
  0xfe   : > { %v69_v23 = vpop.permute.xlu0 %68 }
  0xff   : > { %v76_v25 = vmul.f32 %v1014_v19, %v69_v23  ;;  %v77_v26 = vmul.f32 %v1017_v20, %v69_v23  ;;  %v747_v23 = vld [vmem:[%s1009_s28 + $0x5] sm:$0x1] }
 0x101   : > { %v84_v27 = vadd.f32 %v1020_v21, %v77_v26  ;;  %v83_v31 = vadd.f32 %v1024_v24, %v76_v25 }
 0x103   : > { %v88_v32 = vrot.slane %v84_v27, 7 }
 0x105   : > { %v89_v33 = vsel %vm46_vm3, %v83_v31, %v88_v32 }
 0x106   : > { %v91_v35 = vadd.f32 %v89_v33, %v85_v30  ;;  %v142_v48 = vpop.permute.xlu0 %141 }
 0x107   : > { %v145_v49 = vmul.f32 %v142_v48, %v1017_v20  ;;  %v144_v51 = vmul.f32 %v142_v48, %v1014_v19  ;;  %v754_v48 = vld [vmem:[%s1009_s28 + $0x6] sm:$0x1] }
 0x108   : > { %v99_v37 = vsub.f32 %v91_v35, %v97_v34 }
 0x109   : > { %v147_v50 = vadd.f32 %v145_v49, %v1020_v21  ;;  %v146_v54 = vadd.f32 %v144_v51, %v1024_v24  ;;  %v761_v49 = vld [vmem:[%s1009_s28 + $0x7] sm:$0x1]  ;;  %s771_s28 = sshll.u32 %s301_s3, 4 }
 0x10a   : > { %v101_v38 = vmul.f32 %v100_v36, %v99_v37  ;;  %s307_s29 = sadd.s32 %s771_s28, %s304_s27 }
 0x10b   : > { %v151_v52 = vrot.slane %v147_v50, 7  ;;  %s311_s30 = scalar_lea.vmem [#allocation6], %s307_s29 }
 0x10c   : > { %vm102_vm4 = vcmp.gt.f32.partialorder %v101_v38, 1.0  ;;  %131 = vst.msk [vmem:[%s130_s7] ss:$8 sm:$0x3] %vm971_vm1, %v101_v38  ;;  %v148_v55 = vmul.f32 0.8, %v101_v38 }
 0x10d   : > { %v714_v40 = vsel %vm102_vm4, 1.0, %v920_v39  ;;  %v152_v57 = vsel %vm46_vm3, %v146_v54, %v151_v52  ;;  %s308_s7 = scalar_lea.vmem [#allocation4], %s307_s29  ;;  %s496_s29 = sadd.s32 7, %s1003_s2 }
 0x10e   : > { %v105_v41 = vmul.f32 %v714_v40, %v980_v6  ;;  %127 = vst.msk [vmem:[%s122_s8] ss:$8 sm:$0x3] %vm971_vm1, %v714_v40  ;;  %v154_v62 = vadd.f32 %v152_v57, %v148_v55  ;;  %v163_v0 = vsub.f32 1.0, %v714_v40  ;;  %s316_s8 = sadd.s32 4, %s1003_s2 }
 0x10f   : > { %s361_s9 = sshra.s32 %s316_s8, 3  ;;  %s364_s10 = sand.u32 7, %s316_s8 }
 0x110   : > { %v107_v42 = vperm.slane %v105_v41, 0  ;;  %v108_v43 = vperm.slane %v105_v41, 1  ;;  %s772_s11 = sshll.u32 %s361_s9, 4 }
 0x111   : > { %s367_s12 = sadd.s32 %s772_s11, %s364_s10 }
 0x112   : > { %v111_v44 = vsel %vm46_vm3, %v107_v42, 0.0  ;;  %v112_v45 = vsel %vm46_vm3, %v108_v43, 0.0  ;;  %s371_s14 = scalar_lea.vmem [#allocation6], %s367_s12  ;;  %s368_s15 = scalar_lea.vmem [#allocation4], %s367_s12 }
 0x113   : > { %v113_v46 = vadd.f32 %v112_v45, %v111_v44 }
 0x115   : > { %114 = vadd.xlane.f32.xlu1 %v113_v46 }
 0x12e   : > { %201 = vperm.xlu1 %824, %v726_v47  }
 0x188   : > { %v115_v56 = vpop.xlane.xlu1 %114 }
 0x189   : > { %v117_v58 = vadd.f32 %v116_v53, %v115_v56  ;;  %v156_v59 = vmul.f32 %v115_v56, %v1017_v20  ;;  %v155_v60 = vmul.f32 %v115_v56, %v1014_v19 }
 0x18b   : > { %135 = vst.msk [vmem:[%s1052_s13] sm:$0x1] %vm31_vm0, %v117_v58  ;;  %v159_v61 = vrot.slane %v156_v59, 7  ;;  %v179_v27 = vmul.f32 0.8, %v117_v58 }
 0x18d   : > { %v160_v63 = vsel %vm46_vm3, %v155_v60, %v159_v61 }
 0x18e   : > { %v162_v2 = vsub.f32 %v154_v62, %v160_v63 }
 0x190   : > { %v164_v5 = vmul.f32 %v163_v0, %v162_v2 }
 0x192   : > { %vm165_vm5 = vcmp.gt.f32.partialorder %v164_v5, 1.0  ;;  %192 = vst.msk [vmem:[%s191_s17] ss:$8 sm:$0x3] %vm971_vm1, %v164_v5  ;;  %v208_v32 = vmul.f32 0.8, %v164_v5 }
 0x193   : > { %v720_v7 = vsel %vm165_vm5, 1.0, %v920_v39  ;;  %s421_s17 = sshra.s32 %s376_s16, 3 }
 0x194   : > { %v168_v8 = vmul.f32 %v720_v7, %v980_v6  ;;  %189 = vst.msk [vmem:[%s188_s18] ss:$8 sm:$0x3] %vm971_vm1, %v720_v7  ;;  %v223_v37 = vsub.f32 1.0, %v720_v7  ;;  %s424_s18 = sand.u32 7, %s376_s16  ;;  %s773_s19 = sshll.u32 %s421_s17, 4 }
 0x195   : > { %s427_s20 = sadd.s32 %s773_s19, %s424_s18  ;;  %s922_s16 = smov (%p55_p0), 256  }
 0x196   : > { %v170_v9 = vperm.slane %v168_v8, 0  ;;  %v171_v10 = vperm.slane %v168_v8, 1  ;;  %s431_s21 = scalar_lea.vmem [#allocation6], %s427_s20  ;;  %s428_s22 = scalar_lea.vmem [#allocation4], %s427_s20 }
 0x197   :  { %s923_s17 = smov (%p55_p0), 16   ;;  %s924_s18 = smov (%p55_p0), [#allocation6]  }
 0x198   : > { %v174_v11 = vsel %vm46_vm3, %v170_v9, 0.0  ;;  %v175_v12 = vsel %vm46_vm3, %v171_v10, 0.0  ;;  %s582_s19 = sshll.u32 (%p55_p0), %s924_s18, 4  ;;  %s583_s19 = int_to_ptr.vmem [resolvable:$true] %s582_s19 }
 0x199   : > { %v176_v13 = vadd.f32 %v175_v12, %v174_v11 }
 0x19b   : > { %177 = vadd.xlane.f32.xlu2 %v176_v13 }
 0x1a0   : > { %v202_v15 = vpop.permute.xlu1 %201 }
 0x1a1   : > { %v205_v17 = vmul.f32 %v202_v15, %v1017_v20  ;;  %v204_v18 = vmul.f32 %v202_v15, %v1014_v19 }
 0x1a3   : > { %v207_v22 = vadd.f32 %v205_v17, %v1020_v21  ;;  %v206_v25 = vadd.f32 %v204_v18, %v1024_v24 }
 0x1a5   : > { %v211_v26 = vrot.slane %v207_v22, 7 }
 0x1a7   : > { %v212_v29 = vsel %vm46_vm3, %v206_v25, %v211_v26 }
 0x1a8   : > { %v214_v35 = vadd.f32 %v212_v29, %v208_v32 }
 0x1b3   : > { %261 = vperm.xlu2 %825, %v733_v14  }
 0x1bb   : > { %321 = vperm.xlu2 %825, %v740_v16  }
 0x1c3   : > { %381 = vperm.xlu2 %825, %v747_v23  }
 0x20e   : > { %v178_v28 = vpop.xlane.xlu2 %177 }
 0x20f   : > { %v180_v30 = vadd.f32 %v179_v27, %v178_v28  ;;  %v216_v31 = vmul.f32 %v178_v28, %v1017_v20  ;;  %v215_v33 = vmul.f32 %v178_v28, %v1014_v19 }
 0x211   : > { %724 = vst.msk [vmem:[%s1052_s13 + $0x1] sm:$0x1] %vm31_vm0, %v180_v30  ;;  %v219_v34 = vrot.slane %v216_v31, 7  ;;  %v239_v56 = vmul.f32 0.8, %v180_v30 }
 0x213   : > { %v220_v36 = vsel %vm46_vm3, %v215_v33, %v219_v34 }
 0x214   : > { %v222_v38 = vsub.f32 %v214_v35, %v220_v36 }
 0x216   : > { %v224_v40 = vmul.f32 %v223_v37, %v222_v38  ;;  %v262_v50 = vpop.permute.xlu2 %261 }
 0x217   : > { %v265_v51 = vmul.f32 %v262_v50, %v1017_v20  ;;  %v264_v52 = vmul.f32 %v262_v50, %v1014_v19 }
 0x218   : > { %vm225_vm6 = vcmp.gt.f32.partialorder %v224_v40, 1.0  ;;  %252 = vst.msk [vmem:[%s251_s24] ss:$8 sm:$0x3] %vm971_vm1, %v224_v40  ;;  %v268_v61 = vmul.f32 0.8, %v224_v40 }
 0x219   : > { %v727_v41 = vsel %vm225_vm6, 1.0, %v920_v39  ;;  %v267_v53 = vadd.f32 %v265_v51, %v1020_v21  ;;  %v266_v54 = vadd.f32 %v264_v52, %v1024_v24  ;;  %s481_s24 = sshra.s32 %s436_s23, 3 }
 0x21a   : > { %v228_v42 = vmul.f32 %v727_v41, %v980_v6  ;;  %249 = vst.msk [vmem:[%s248_s25] ss:$8 sm:$0x3] %vm971_vm1, %v727_v41  ;;  %v283_v5 = vsub.f32 1.0, %v727_v41  ;;  %s484_s25 = sand.u32 7, %s436_s23  ;;  %s774_s26 = sshll.u32 %s481_s24, 4 }
 0x21b   : > { %v271_v55 = vrot.slane %v267_v53, 7  ;;  %s487_s3 = sadd.s32 %s774_s26, %s484_s25 }
 0x21c   : > { %v230_v43 = vperm.slane %v228_v42, 0  ;;  %v231_v44 = vperm.slane %v228_v42, 1  ;;  %s491_s27 = scalar_lea.vmem [#allocation6], %s487_s3  ;;  %s488_s28 = scalar_lea.vmem [#allocation4], %s487_s3 }
 0x21d   : > { %v272_v58 = vsel %vm46_vm3, %v266_v54, %v271_v55 }
 0x21e   : > { %v234_v45 = vsel %vm46_vm3, %v230_v43, 0.0  ;;  %v235_v46 = vsel %vm46_vm3, %v231_v44, 0.0  ;;  %v274_v0 = vadd.f32 %v272_v58, %v268_v61  ;;  %v322_v16 = vpop.permute.xlu2 %321 }
 0x21f   : > { %v236_v47 = vadd.f32 %v235_v46, %v234_v45  ;;  %v325_v17 = vmul.f32 %v322_v16, %v1017_v20  ;;  %v324_v18 = vmul.f32 %v322_v16, %v1014_v19 }
 0x221   : > { %237 = vadd.xlane.f32.xlu0 %v236_v47  ;;  %v327_v22 = vadd.f32 %v325_v17, %v1020_v21  ;;  %v326_v23 = vadd.f32 %v324_v18, %v1024_v24 }
 0x223   : > { %v331_v25 = vrot.slane %v327_v22, 7 }
 0x225   : > { %v332_v31 = vsel %vm46_vm3, %v326_v23, %v331_v25 }
 0x226   : > { %v382_v47 = vpop.permute.xlu2 %381 }
 0x235   : > { %441 = vperm.xlu0 %823, %v754_v48   ;;  %v385_v48 = vmul.f32 %v382_v47, %v1017_v20 }
 0x237   : > { %v387_v50 = vadd.f32 %v385_v48, %v1020_v21 }
 0x239   : > { %v391_v52 = vrot.slane %v387_v50, 7 }
 0x23d   : > { %501 = vperm.xlu0 %823, %v761_v49   ;;  %v384_v49 = vmul.f32 %v382_v47, %v1014_v19 }
 0x23f   : > { %v386_v51 = vadd.f32 %v384_v49, %v1024_v24 }
 0x241   : > { %v392_v58 = vsel %vm46_vm3, %v386_v51, %v391_v52 }
 0x294   : > { %v238_v57 = vpop.xlane.xlu0 %237 }
 0x295   : > { %v240_v59 = vadd.f32 %v239_v56, %v238_v57  ;;  %v276_v60 = vmul.f32 %v238_v57, %v1017_v20  ;;  %v275_v62 = vmul.f32 %v238_v57, %v1014_v19 }
 0x297   : > { %731 = vst.msk [vmem:[%s1052_s13 + $0x2] sm:$0x1] %vm31_vm0, %v240_v59  ;;  %v279_v63 = vrot.slane %v276_v60, 7  ;;  %v299_v26 = vmul.f32 0.8, %v240_v59 }
 0x299   : > { %v280_v2 = vsel %vm46_vm3, %v275_v62, %v279_v63 }
 0x29a   : > { %v282_v7 = vsub.f32 %v274_v0, %v280_v2 }
 0x29c   : > { %v284_v8 = vmul.f32 %v283_v5, %v282_v7 }
 0x29e   : > { %vm285_vm7 = vcmp.gt.f32.partialorder %v284_v8, 1.0  ;;  %312 = vst.msk [vmem:[%s311_s30] ss:$8 sm:$0x3] %vm971_vm1, %v284_v8  ;;  %v328_v27 = vmul.f32 0.8, %v284_v8 }
 0x29f   : > { %v734_v9 = vsel %vm285_vm7, 1.0, %v920_v39  ;;  %s541_s30 = sshra.s32 %s496_s29, 3 }
 0x2a0   : > { %v288_v10 = vmul.f32 %v734_v9, %v980_v6  ;;  %309 = vst.msk [vmem:[%s308_s7] ss:$8 sm:$0x3] %vm971_vm1, %v734_v9  ;;  %v334_v34 = vadd.f32 %v332_v31, %v328_v27  ;;  %v343_v36 = vsub.f32 1.0, %v734_v9  ;;  %s544_s7 = sand.u32 7, %s496_s29  ;;  %s775_s8 = sshll.u32 %s541_s30, 4 }
 0x2a1   : > { %s547_s2 = sadd.s32 %s775_s8, %s544_s7 }
 0x2a2   : > { %v290_v11 = vperm.slane %v288_v10, 0  ;;  %v291_v12 = vperm.slane %v288_v10, 1  ;;  %s551_s9 = scalar_lea.vmem [#allocation6], %s547_s2  ;;  %s548_s10 = scalar_lea.vmem [#allocation4], %s547_s2 }
 0x2a4   : > { %v294_v13 = vsel %vm46_vm3, %v290_v11, 0.0  ;;  %v295_v14 = vsel %vm46_vm3, %v291_v12, 0.0 }
 0x2a5   : > { %v296_v15 = vadd.f32 %v295_v14, %v294_v13 }
 0x2a7   : > { %297 = vadd.xlane.f32.xlu1 %v296_v15  ;;  %v442_v13 = vpop.permute.xlu0 %441 }
 0x2a8   : > { %v445_v14 = vmul.f32 %v442_v13, %v1017_v20  ;;  %v444_v16 = vmul.f32 %v442_v13, %v1014_v19 }
 0x2aa   : > { %v447_v15 = vadd.f32 %v445_v14, %v1020_v21  ;;  %v446_v25 = vadd.f32 %v444_v16, %v1024_v24 }
 0x2ac   : > { %v451_v17 = vrot.slane %v447_v15, 7 }
 0x31a   : > { %v298_v28 = vpop.xlane.xlu1 %297 }
 0x31b   : > { %v300_v29 = vadd.f32 %v299_v26, %v298_v28  ;;  %v336_v30 = vmul.f32 %v298_v28, %v1017_v20  ;;  %v335_v32 = vmul.f32 %v298_v28, %v1014_v19  ;;  %v452_v28 = vsel %vm46_vm3, %v446_v25, %v451_v17 }
 0x31d   : > { %738 = vst.msk [vmem:[%s1052_s13 + $0x3] sm:$0x1] %vm31_vm0, %v300_v29  ;;  %v339_v33 = vrot.slane %v336_v30, 7  ;;  %v359_v53 = vmul.f32 0.8, %v300_v29 }
 0x31f   : > { %v340_v35 = vsel %vm46_vm3, %v335_v32, %v339_v33 }
 0x320   : > { %v342_v37 = vsub.f32 %v334_v34, %v340_v35 }
 0x322   : > { %v344_v38 = vmul.f32 %v343_v36, %v342_v37 }
 0x324   : > { %vm345_vm8 = vcmp.gt.f32.partialorder %v344_v38, 1.0  ;;  %372 = vst.msk [vmem:[%s371_s14] ss:$8 sm:$0x3] %vm971_vm1, %v344_v38  ;;  %v388_v54 = vmul.f32 0.8, %v344_v38 }
 0x325   : > { %v741_v40 = vsel %vm345_vm8, 1.0, %v920_v39  ;;  %s921_s14 = smov (%p55_p0), [#allocation4]  }
 0x326   : > { %v348_v41 = vmul.f32 %v741_v40, %v980_v6  ;;  %369 = vst.msk [vmem:[%s368_s15] ss:$8 sm:$0x3] %vm971_vm1, %v741_v40  ;;  %v394_v61 = vadd.f32 %v392_v58, %v388_v54  ;;  %v403_v63 = vsub.f32 1.0, %v741_v40  ;;  %s569_s15 = sshll.u32 (%p55_p0), %s921_s14, 4  ;;  %s570_s15 = int_to_ptr.vmem [resolvable:$true] %s569_s15 }
 0x328   : > { %v350_v42 = vperm.slane %v348_v41, 0  ;;  %v351_v43 = vperm.slane %v348_v41, 1 }
 0x32a   : > { %v354_v44 = vsel %vm46_vm3, %v350_v42, 0.0  ;;  %v355_v45 = vsel %vm46_vm3, %v351_v43, 0.0 }
 0x32b   : > { %v356_v46 = vadd.f32 %v355_v45, %v354_v44  ;;  %v502_v44 = vpop.permute.xlu0 %501 }
 0x32c   : > { %v505_v45 = vmul.f32 %v502_v44, %v1017_v20  ;;  %v504_v47 = vmul.f32 %v502_v44, %v1014_v19 }
 0x32d   : > { %357 = vadd.xlane.f32.xlu2 %v356_v46 }
 0x32e   : > { %v507_v46 = vadd.f32 %v505_v45, %v1020_v21  ;;  %v506_v52 = vadd.f32 %v504_v47, %v1024_v24 }
 0x330   : > { %v511_v48 = vrot.slane %v507_v46, 7 }
 0x3a0   : > { %v358_v55 = vpop.xlane.xlu2 %357 }
 0x3a1   : > { %v360_v56 = vadd.f32 %v359_v53, %v358_v55  ;;  %v396_v57 = vmul.f32 %v358_v55, %v1017_v20  ;;  %v395_v59 = vmul.f32 %v358_v55, %v1014_v19  ;;  %v512_v55 = vsel %vm46_vm3, %v506_v52, %v511_v48 }
 0x3a3   : > { %745 = vst.msk [vmem:[%s1052_s13 + $0x4] sm:$0x1] %vm31_vm0, %v360_v56  ;;  %v399_v60 = vrot.slane %v396_v57, 7  ;;  %v419_v18 = vmul.f32 0.8, %v360_v56 }
 0x3a5   : > { %v400_v62 = vsel %vm46_vm3, %v395_v59, %v399_v60 }
 0x3a6   : > { %v402_v0 = vsub.f32 %v394_v61, %v400_v62 }
 0x3a8   : > { %v404_v2 = vmul.f32 %v403_v63, %v402_v0 }
 0x3aa   : > { %432 = vst.msk [vmem:[%s431_s21] ss:$8 sm:$0x3] %vm971_vm1, %v404_v2  ;;  %vm405_vm9 = vcmp.gt.f32.partialorder %v404_v2, 1.0  ;;  %v448_v22 = vmul.f32 0.8, %v404_v2 }
 0x3ab   : > { %v748_v5 = vsel %vm405_vm9, 1.0, %v920_v39 }
 0x3ac   : > { %v408_v7 = vmul.f32 %v748_v5, %v980_v6  ;;  %429 = vst.msk [vmem:[%s428_s22] ss:$8 sm:$0x3] %vm971_vm1, %v748_v5  ;;  %v454_v31 = vadd.f32 %v452_v28, %v448_v22  ;;  %v463_v33 = vsub.f32 1.0, %v748_v5 }
 0x3ae   : > { %v410_v8 = vperm.slane %v408_v7, 0  ;;  %v411_v9 = vperm.slane %v408_v7, 1 }
 0x3b0   : > { %v414_v10 = vsel %vm46_vm3, %v410_v8, 0.0  ;;  %v415_v11 = vsel %vm46_vm3, %v411_v9, 0.0 }
 0x3b1   : > { %v416_v12 = vadd.f32 %v415_v11, %v414_v10 }
 0x3b3   : > { %417 = vadd.xlane.f32.xlu1 %v416_v12 }
 0x426   : > { %v418_v23 = vpop.xlane.xlu1 %417 }
 0x427   : > { %v420_v26 = vadd.f32 %v419_v18, %v418_v23  ;;  %v456_v27 = vmul.f32 %v418_v23, %v1017_v20  ;;  %v455_v29 = vmul.f32 %v418_v23, %v1014_v19 }
 0x429   : > { %752 = vst.msk [vmem:[%s1052_s13 + $0x5] sm:$0x1] %vm31_vm0, %v420_v26  ;;  %v459_v30 = vrot.slane %v456_v27, 7  ;;  %v479_v49 = vmul.f32 0.8, %v420_v26 }
 0x42b   : > { %v460_v32 = vsel %vm46_vm3, %v455_v29, %v459_v30 }
 0x42c   : > { %v462_v34 = vsub.f32 %v454_v31, %v460_v32 }
 0x42e   : > { %v464_v35 = vmul.f32 %v463_v33, %v462_v34 }
 0x430   : > { %vm465_vm10 = vcmp.gt.f32.partialorder %v464_v35, 1.0  ;;  %492 = vst.msk [vmem:[%s491_s27] ss:$8 sm:$0x3] %vm971_vm1, %v464_v35  ;;  %v508_v50 = vmul.f32 0.8, %v464_v35 }
 0x431   : > { %v755_v36 = vsel %vm465_vm10, 1.0, %v920_v39 }
 0x432   : > { %v468_v37 = vmul.f32 %v755_v36, %v980_v6  ;;  %489 = vst.msk [vmem:[%s488_s28] ss:$8 sm:$0x3] %vm971_vm1, %v755_v36  ;;  %v514_v57 = vadd.f32 %v512_v55, %v508_v50  ;;  %v523_v59 = vsub.f32 1.0, %v755_v36 }
 0x434   : > { %v470_v38 = vperm.slane %v468_v37, 0  ;;  %v471_v40 = vperm.slane %v468_v37, 1 }
 0x436   : > { %v474_v41 = vsel %vm46_vm3, %v470_v38, 0.0  ;;  %v475_v42 = vsel %vm46_vm3, %v471_v40, 0.0 }
 0x437   : > { %v476_v43 = vadd.f32 %v475_v42, %v474_v41 }
 0x439   : > { %477 = vadd.xlane.f32.xlu1 %v476_v43 }
 0x4ac   : > { %v478_v51 = vpop.xlane.xlu1 %477 }
 0x4ad   : > { %v480_v53 = vadd.f32 %v479_v49, %v478_v51  ;;  %v516_v54 = vmul.f32 %v478_v51, %v1017_v20  ;;  %v515_v21 = vmul.f32 %v478_v51, %v1014_v19 }
 0x4af   : > { %759 = vst.msk [vmem:[%s1052_s13 + $0x6] sm:$0x1] %vm31_vm0, %v480_v53  ;;  %v519_v56 = vrot.slane %v516_v54, 7  ;;  %v539_v2 = vmul.f32 0.8, %v480_v53 }
 0x4b1   : > { %v520_v58 = vsel %vm46_vm3, %v515_v21, %v519_v56 }
 0x4b2   : > { %v522_v60 = vsub.f32 %v514_v57, %v520_v58 }
 0x4b4   : > { %v524_v61 = vmul.f32 %v523_v59, %v522_v60  }
 0x4b6   : > { %552 = vst.msk [vmem:[%s551_s9] ss:$8 sm:$0x3] %vm971_vm1, %v524_v61  ;;  %vm525_vm11 = vcmp.gt.f32.partialorder %v524_v61, 1.0  ;;  %v1219_v7 = vmov %v524_v61 }
 0x4b7   : > { %v762_v8 = vsel %vm525_vm11, 1.0, %v920_v39   ;;  %560 = vst.msk [vmem:[#allocation2] sm:$0x3] (%p55_p0), %vm971_vm1, %v524_v61  ;;  %590 = dma.vmem_to_hbm [thread:$0]  (%p55_p0), %s583_s19, 4096, %s585_s0, [#allocation7], %s922_s16, %s922_s16, %s923_s17  }
 0x4b8   : > { %v528_v20 = vmul.f32 %v762_v8, %v980_v6  ;;  %549 = vst.msk [vmem:[%s548_s10] ss:$8 sm:$0x3] %vm971_vm1, %v762_v8 }
 0x4ba   : > { %v530_v19 = vperm.slane %v528_v20, 0  ;;  %v531_v24 = vperm.slane %v528_v20, 1 }
 0x4bc   : > { %v534_v62 = vsel %vm46_vm3, %v530_v19, 0.0  ;;  %v535_v63 = vsel %vm46_vm3, %v531_v24, 0.0 }
 0x4bd   : > { %v536_v0 = vadd.f32 %v535_v63, %v534_v62 }
 0x4bf   : > { %537 = vadd.xlane.f32.xlu0 %v536_v0 }
 0x531   :  { %57 = sbr.rel (!%p55_p0) target bundleno = 137 (0x89), region = 95 }
 0x532   : > { %v538_v15 = vpop.xlane.xlu0 %537  }
 0x533   : > { %v540_v9 = vadd.f32 %v539_v2, %v538_v15  }
 0x535   : > { %766 = vst.msk [vmem:[%s1052_s13 + $0x7] sm:$0x1] %vm31_vm0, %v540_v9  ;;  %v1218_v5 = vmov %v540_v9  ;;  %s571_s13 = sshll.u32 (%p55_p0), %s1214_s5, 4  ;;  %s572_s13 = int_to_ptr.hbm [resolvable:$true] %s571_s13 }
 0x536   :  { %562 = vst.msk [vmem:[#allocation3] sm:$0x1] %vm31_vm0, %v540_v9  ;;  %577 = dma.vmem_to_hbm [thread:$0]  %s570_s15, 4096, %s572_s13, [#allocation5], %s922_s16, %s922_s16, %s923_s17  }
 0x537   :  { %894 = dma.done.wait [#allocation5], 4096  }
 0x538   :  { %895 = vsyncadd [#allocation5], 4294963200 }
 0x539   :  { %896 = dma.done.wait [#allocation7], 4096  }
 0x53a   :  { %897 = vsyncadd [#allocation7], 4294963200 }
 0x53b   :  { %601 = vsyncpa [#allocation5], 1 }
 0x53c   :  { %602 = vsyncpa [#allocation7], 1 }

</bundles_post_ra>
